<compile_context>
chip_gen: v5e
topology: v5e:2x2
jax: 0.10.0
libtpu: 0.0.40
codegen_flags: <defaults>
</compile_context>

<pallas_src>
import math
import numpy as np
import jax
import jax.numpy as jnp
from jax import lax
from jax.experimental import pallas as pl
from jax.experimental.pallas import tpu as pltpu

# ---------------- model hyper-parameters (small, consistent with the module) ----
B = 2                       # batch
S = 8                       # sequence length
IN_DIM = 32                 # in_dim == out_dim (required by the residual add)
OUT_DIM = 32
EXPANSION = 2               # expansion_rate
HIDDEN = OUT_DIM * EXPANSION
LN_EPS = 1e-5               # nn.LayerNorm default
DROP_P = 0.1                # dropout prob (identity in eval mode)

# packed parameter-slab row layout (all rows are HIDDEN=64 wide, f32)
W1_ROWS = IN_DIM                       # rows [0, 32): w1  (IN_DIM, HIDDEN)
W2T_ROW0 = IN_DIM                      # rows [32, 64): w2^T (OUT_DIM, HIDDEN)
VEC_ROW0 = IN_DIM + OUT_DIM            # rows [64, 68): b1 / b2 / gamma / beta
SLAB_ROWS = 72                         # padded to a multiple of 8 sublanes


# ---------------- Pallas kernel ------------------------------------------------
def ff_kernel(x_ref, slab_ref, o_ref):
    x = x_ref[...]                                  # (B*S, IN_DIM), all tokens at once

    w1 = slab_ref[0:W1_ROWS, :]                     # (IN_DIM, HIDDEN)
    w2t = slab_ref[W2T_ROW0:W2T_ROW0 + OUT_DIM, :]  # (OUT_DIM, HIDDEN) == w2 transposed
    vecs = slab_ref[VEC_ROW0:VEC_ROW0 + 4, :]       # (4, HIDDEN) packed small vectors
    b1 = vecs[0:1, :]                               # (1, HIDDEN)
    b2 = vecs[1:2, :OUT_DIM]                        # (1, OUT_DIM)
    gamma = vecs[2:3, :OUT_DIM]                     # LayerNorm weight
    beta = vecs[3:4, :OUT_DIM]                      # LayerNorm bias

    # hidden dense + activation (Dense(activation=ReLU, norm=None))
    h = jnp.dot(x, w1, preferred_element_type=jnp.float32) + b1
    h = jnp.maximum(h, 0.0)

    # output dense (Dense(activation=None)); contract h's last dim with w2t's last dim,
    # so the pre-transposed weight needs no in-kernel transpose.
    y = lax.dot_general(h, w2t, dimension_numbers=(((1,), (1,)), ((), ())),
                        preferred_element_type=jnp.float32) + b2

    # TODO(synk): training-mode dropout (p>0) not implemented; eval-mode dropout is identity.

    # residual + LayerNorm (biased variance, eps inside rsqrt). One-pass statistics:
    # independent sum(z) / sum(z*z) reductions -> decoupled XLU pushes.
    z = x + y
    inv_d = 1.0 / OUT_DIM
    s1 = jnp.sum(z, axis=-1, keepdims=True)
    s2 = jnp.sum(z * z, axis=-1, keepdims=True)
    mean = s1 * inv_d
    var = s2 * inv_d - mean * mean
    out = (z - mean) * lax.rsqrt(var + LN_EPS) * gamma + beta

    o_ref[...] = out.astype(o_ref.dtype)


def feed_forward(x, param_slab):
    """x: (B, S, IN_DIM) -> (B, S, OUT_DIM). Single pallas_call, no grid, 2 inbound DMAs."""
    bs = B * S
    x2 = x.reshape(bs, IN_DIM)           # wrapper-side layout plumbing
    vmem_full = pl.BlockSpec(memory_space=pltpu.MemorySpace.VMEM)
    bytes_accessed = (bs * IN_DIM + SLAB_ROWS * HIDDEN + bs * OUT_DIM) * 4
    out = pl.pallas_call(
        ff_kernel,
        out_shape=jax.ShapeDtypeStruct((bs, OUT_DIM), jnp.float32),
        in_specs=[vmem_full, vmem_full],
        out_specs=vmem_full,
        cost_estimate=pl.CostEstimate(
            flops=2 * bs * (IN_DIM * HIDDEN + HIDDEN * OUT_DIM),
            transcendentals=0,
            bytes_accessed=bytes_accessed),
    )(x2, param_slab)
    return out.reshape(B, S, OUT_DIM)


# ---------------- deterministic parameter construction --------------------------
def xavier_uniform(key, fan_in, fan_out):
    bound = math.sqrt(6.0 / (fan_in + fan_out))
    # stored as (in, out): PyTorch's (out, in) weight, pre-transposed
    return jax.random.uniform(key, (fan_in, fan_out), jnp.float32, -bound, bound)


def make_params(key):
    k1, k2, k3, k4, k5, k6 = jax.random.split(key, 6)
    w1 = xavier_uniform(k1, IN_DIM, HIDDEN)          # (IN_DIM, HIDDEN)
    w2 = xavier_uniform(k2, HIDDEN, OUT_DIM)         # (HIDDEN, OUT_DIM)
    # The module initializes biases to 0 and LayerNorm to (1, 0); use small non-trivial
    # values instead so the correctness check exercises every term of the forward pass.
    b1 = 0.1 * jax.random.normal(k3, (HIDDEN,), jnp.float32)
    b2 = 0.1 * jax.random.normal(k4, (OUT_DIM,), jnp.float32)
    gamma = 1.0 + 0.1 * jax.random.normal(k5, (OUT_DIM,), jnp.float32)
    beta = 0.1 * jax.random.normal(k6, (OUT_DIM,), jnp.float32)

    # Pack everything into ONE (SLAB_ROWS, HIDDEN) f32 slab -> a single inbound weight DMA.
    slab = jnp.zeros((SLAB_ROWS, HIDDEN), jnp.float32)
    slab = slab.at[0:W1_ROWS, :].set(w1)
    slab = slab.at[W2T_ROW0:W2T_ROW0 + OUT_DIM, :].set(w2.T)   # w2 pre-transposed
    slab = slab.at[VEC_ROW0 + 0, :].set(b1)
    slab = slab.at[VEC_ROW0 + 1, :OUT_DIM].set(b2)
    slab = slab.at[VEC_ROW0 + 2, :OUT_DIM].set(gamma)
    slab = slab.at[VEC_ROW0 + 3, :OUT_DIM].set(beta)

    raw = (w1, b1, w2, b2, gamma, beta)
    return raw, slab


# ---------------- pure-JAX reference (same math, for correctness check) ----------
def reference_forward(x, raw_params):
    w1, b1, w2, b2, gamma, beta = raw_params
    h = jnp.maximum(x @ w1 + b1, 0.0)        # hidden dense + ReLU
    y = h @ w2 + b2                          # output dense
    z = x + y                                # dropout(eval) == identity, then residual
    mean = jnp.mean(z, axis=-1, keepdims=True)
    var = jnp.mean((z - mean) ** 2, axis=-1, keepdims=True)
    return (z - mean) * lax.rsqrt(var + LN_EPS) * gamma + beta


if __name__ == "__main__":
    key = jax.random.PRNGKey(0)
    kx, kp = jax.random.split(key)
    x = jax.random.normal(kx, (B, S, IN_DIM), jnp.float32)
    raw_params, param_slab = make_params(kp)

    out = feed_forward(x, param_slab)
    out = jax.block_until_ready(out)

    ref = reference_forward(x, raw_params)
    assert out.shape == (B, S, OUT_DIM)
    assert np.allclose(np.asarray(out), np.asarray(ref), atol=1e-4, rtol=1e-4), (
        "Pallas kernel mismatch vs reference")
    print("KERNEL_OK")
</pallas_src>

<mosaic_0001>
module attributes {stable_mosaic.version = 11 : i64} {
  func.func @ff_kernel(%arg0: memref<16x32xf32, #tpu.memory_space<vmem>>, %arg1: memref<72x64xf32, #tpu.memory_space<vmem>>, %arg2: memref<16x32xf32, #tpu.memory_space<vmem>>) attributes {dimension_semantics = [], scalar_prefetch = 0 : i64, scratch_operands = 0 : i64, tpu.core_type = #tpu.core_type<tc>} {
    %c0 = arith.constant 0 : index
    %c0_0 = arith.constant 0 : index
    %0 = vector.load %arg0[%c0, %c0_0] : memref<16x32xf32, #tpu.memory_space<vmem>>, vector<16x32xf32>
    %c0_1 = arith.constant 0 : index
    %c0_2 = arith.constant 0 : index
    %1 = vector.load %arg1[%c0_1, %c0_2] : memref<72x64xf32, #tpu.memory_space<vmem>>, vector<32x64xf32>
    %c32 = arith.constant 32 : index
    %c0_3 = arith.constant 0 : index
    %2 = vector.load %arg1[%c32, %c0_3] : memref<72x64xf32, #tpu.memory_space<vmem>>, vector<32x64xf32>
    %c64 = arith.constant 64 : index
    %c0_4 = arith.constant 0 : index
    %3 = vector.load %arg1[%c64, %c0_4] : memref<72x64xf32, #tpu.memory_space<vmem>>, vector<4x64xf32>
    %4 = vector.extract_strided_slice %3 {offsets = [0, 0], sizes = [1, 64], strides = [1, 1]} : vector<4x64xf32> to vector<1x64xf32>
    %5 = vector.extract_strided_slice %3 {offsets = [1, 0], sizes = [1, 32], strides = [1, 1]} : vector<4x64xf32> to vector<1x32xf32>
    %6 = vector.extract_strided_slice %3 {offsets = [2, 0], sizes = [1, 32], strides = [1, 1]} : vector<4x64xf32> to vector<1x32xf32>
    %7 = vector.extract_strided_slice %3 {offsets = [3, 0], sizes = [1, 32], strides = [1, 1]} : vector<4x64xf32> to vector<1x32xf32>
    %cst = arith.constant dense<0.000000e+00> : vector<16x64xf32>
    %8 = tpu.matmul %0, %1, %cst {dimension_numbers = #tpu.dot_dimension_numbers<[1], [0], [0], [1], [0, 0, 1, 1], [], []>} : vector<16x32xf32>, vector<32x64xf32>, vector<16x64xf32> -> vector<16x64xf32>
    %9 = vector.broadcast %4 : vector<1x64xf32> to vector<16x64xf32>
    %10 = arith.addf %8, %9 : vector<16x64xf32>
    %cst_5 = arith.constant 0.000000e+00 : f32
    %11 = vector.broadcast %cst_5 : f32 to vector<16x64xf32>
    %12 = arith.maximumf %10, %11 : vector<16x64xf32>
    %cst_6 = arith.constant dense<0.000000e+00> : vector<16x32xf32>
    %13 = tpu.matmul %12, %2, %cst_6 {dimension_numbers = #tpu.dot_dimension_numbers<[1], [1], [0], [0], [0, 0, 1, 0], [], []>} : vector<16x64xf32>, vector<32x64xf32>, vector<16x32xf32> -> vector<16x32xf32>
    %14 = vector.broadcast %5 : vector<1x32xf32> to vector<16x32xf32>
    %15 = arith.addf %13, %14 : vector<16x32xf32>
    %16 = arith.addf %0, %15 : vector<16x32xf32>
    %cst_7 = arith.constant dense<0.000000e+00> : vector<16xf32>
    %17 = vector.multi_reduction <add>, %16, %cst_7 [1] : vector<16x32xf32> to vector<16xf32>
    %18 = vector.shape_cast %17 : vector<16xf32> to vector<16x1xf32>
    %19 = arith.mulf %16, %16 : vector<16x32xf32>
    %cst_8 = arith.constant dense<0.000000e+00> : vector<16xf32>
    %20 = vector.multi_reduction <add>, %19, %cst_8 [1] : vector<16x32xf32> to vector<16xf32>
    %21 = vector.shape_cast %20 : vector<16xf32> to vector<16x1xf32>
    %cst_9 = arith.constant 3.125000e-02 : f32
    %22 = vector.broadcast %cst_9 : f32 to vector<16x1xf32>
    %23 = arith.mulf %18, %22 : vector<16x1xf32>
    %cst_10 = arith.constant 3.125000e-02 : f32
    %24 = vector.broadcast %cst_10 : f32 to vector<16x1xf32>
    %25 = arith.mulf %21, %24 : vector<16x1xf32>
    %26 = arith.mulf %23, %23 : vector<16x1xf32>
    %27 = arith.subf %25, %26 : vector<16x1xf32>
    %28 = vector.broadcast %23 : vector<16x1xf32> to vector<16x32xf32>
    %29 = arith.subf %16, %28 : vector<16x32xf32>
    %cst_11 = arith.constant 9.99999974E-6 : f32
    %30 = vector.broadcast %cst_11 : f32 to vector<16x1xf32>
    %31 = arith.addf %27, %30 : vector<16x1xf32>
    %32 = math.rsqrt %31 : vector<16x1xf32>
    %33 = vector.broadcast %32 : vector<16x1xf32> to vector<16x32xf32>
    %34 = arith.mulf %29, %33 : vector<16x32xf32>
    %35 = vector.broadcast %6 : vector<1x32xf32> to vector<16x32xf32>
    %36 = arith.mulf %34, %35 : vector<16x32xf32>
    %37 = vector.broadcast %7 : vector<1x32xf32> to vector<16x32xf32>
    %38 = arith.addf %36, %37 : vector<16x32xf32>
    %c0_12 = arith.constant 0 : index
    %c0_13 = arith.constant 0 : index
    %39 = vector.load %arg2[%c0_12, %c0_13] : memref<16x32xf32, #tpu.memory_space<vmem>>, vector<16x32xf32>
    tpu.vector_store %arg2[%c0_12, %c0_13], %38 {strides = array<i32>} : memref<16x32xf32, #tpu.memory_space<vmem>>, vector<16x32xf32>,
    return
  }
}

</mosaic_0001>

<bundles_post_ra>
// kernel: tpu_custom_call.1
= control target key start
LH: loop header
LB: loop body
LE: loop exit
PB: predicated region body
PF: predicated region fallthrough
CT: control target
= control target key end

     0   :  { %vm57_vm0 = vcmask 523264   ;;  %s302_s0 = inlined_call_operand.vmem [shape: f32[16,32], index: 0, kind: input, shape index: {}]   ;;  %s303_s1 = inlined_call_operand.vmem [shape: f32[72,64], index: 1, kind: input, shape index: {}]   ;;  %s304_s2 = inlined_call_operand.hbm [shape: f32[16,32], index: 2, kind: output, shape index: {}]  }
   0x1   :  { %v17_v0 = vld [vmem:[%s303_s1 + $0x18] sm:$0xff]  ;;  %v16_v1 = vld [vmem:[%s303_s1 + $0x10] sm:$0xff]  ;;  %v15_v2 = vld [vmem:[%s303_s1 + $0x8] sm:$0xff] }
   0x2   :  { %43 = vmatpush.msra.mxu0 %v17_v0  ;;  %183 = vmatpush.msra.mxu3 %v17_v0  ;;  %v21_v3 = vld [vmem:[%s303_s1 + $0x38] sm:$0xff] }
   0x4   :  { %44 = vmatpush.msra.mxu0 %v16_v1  ;;  %184 = vmatpush.msra.mxu3 %v16_v1 }
   0x5   :  { %7 = vsyncpa [#allocation3], 0  ;;  %v14_v4 = vld [vmem:[%s303_s1] sm:$0xff]  ;;  %177 = vmatpush.xpose.msk.msra.mxu1 %vm57_vm0, %v21_v3  ;;  %187 = vmatpush.xpose.msk.msra.mxu2 %vm57_vm0, %v21_v3  ;;  %vm24_vm1 = vcmask 261120   ;;  %v13_v6 = vld [vmem:[%s302_s0 + $0x8] sm:$0xff]  ;;  %s163_s5 = sshll.u32 %s304_s2, 4  ;;  %s164_s5 = int_to_ptr.hbm [resolvable:$true] %s163_s5 }
   0x6   :  { %45 = vmatpush.msra.mxu0 %v15_v2  ;;  %185 = vmatpush.msra.mxu3 %v15_v2  ;;  %v12_v5 = vld [vmem:[%s302_s0] sm:$0xff]  ;;  %v20_v7 = vld [vmem:[%s303_s1 + $0x30] sm:$0xff]  ;;  %v19_v8 = vld [vmem:[%s303_s1 + $0x28] sm:$0xff]  ;;  %s225_s6 = smov 128   ;;  %s226_s7 = smov 8  }
   0x7   :  { %v18_v9 = vld [vmem:[%s303_s1 + $0x20] sm:$0xff] }
   0x8   :  { %46 = vmatpush.msra.mxu0 %v14_v4  ;;  %186 = vmatpush.msra.mxu3 %v14_v4  ;;  %v285_v10 = vld [vmem:[%s303_s1 + $0x40] sm:$0xf]  ;;  %s224_s1 = smov [#allocation2]  }
   0x9   :  { %175 = vmatmul.msk.f32.vlgmr.msra.gmra.mxu0 %vm24_vm1, %v12_v5  ;;  %176 = vmatmul.msk.f32.vlgmr.msra.gmra.mxu3 %vm24_vm1, %v13_v6  ;;  %v23_v11 = vperm.slane %v285_v10, 0  ;;  %v56_v18 = vperm.slane %v285_v10, 1  ;;  %v149_v51 = vperm.slane %v285_v10, 2  ;;  %v152_v55 = vperm.slane %v285_v10, 3  ;;  %s161_s30 = sshll.u32 %s224_s1, 4  ;;  %s162_s30 = int_to_ptr.vmem [resolvable:$true] %s161_s30 }
   0xa   :  { %178 = vmatpush.xpose.msk.msra.mxu1 %vm57_vm0, %v20_v7  ;;  %188 = vmatpush.xpose.msk.msra.mxu2 %vm57_vm0, %v20_v7 }
   0xe   :  { %179 = vmatpush.xpose.msk.msra.mxu1 %vm57_vm0, %v19_v8  ;;  %189 = vmatpush.xpose.msk.msra.mxu2 %vm57_vm0, %v19_v8 }
  0x12   :  { %180 = vmatpush.xpose.msk.msra.mxu1 %vm57_vm0, %v18_v9  ;;  %190 = vmatpush.xpose.msk.msra.mxu2 %vm57_vm0, %v18_v9 }
  0x86   :  { %v48_v12 = vpop.f32.mrf.mxu0 }
  0x87   :  { %v49_v13 = vadd.f32 %v48_v12, %v23_v11 }
  0x89   :  { %v54_v14 = vmax.f32 %v49_v13, 0.0 }
  0x8b   :  { %181 = vmatmul.msk.f32.vlgmr.msra.gmra.mxu1 %vm57_vm0, %v54_v14 }
  0x8c   :  { %v51_v15 = vpop.f32.mrf.mxu3 }
  0x8d   :  { %v52_v16 = vadd.f32 %v51_v15, %v23_v11 }
  0x8f   :  { %v55_v17 = vmax.f32 %v52_v16, 0.0 }
  0x91   :  { %182 = vmatmul.msk.f32.vlgmr.msra.gmra.mxu2 %vm57_vm0, %v55_v17 }
 0x108   :  { %v93_v19 = vpop.f32.mrf.mxu1 }
 0x109   :  { %v94_v20 = vadd.f32 %v93_v19, %v56_v18 }
 0x10b   :  { %v99_v21 = vadd.f32 %v94_v20, %v12_v5 }
 0x10d   :  { %v101_v22 = vsel %vm24_vm1, %v99_v21, 0.0  ;;  %v107_v23 = vmul.f32 %v99_v21, %v99_v21 }
 0x10e   :  { %102 = vadd.xlane.f32.xlu0 %v101_v22 }
 0x10f   :  { %v109_v24 = vsel %vm24_vm1, %v107_v23, 0.0 }
 0x110   :  { %110 = vadd.xlane.f32.xlu1 %v109_v24 }
 0x114   :  { %v96_v25 = vpop.f32.mrf.mxu2 }
 0x115   :  { %v97_v26 = vadd.f32 %v96_v25, %v56_v18 }
 0x117   :  { %v100_v27 = vadd.f32 %v97_v26, %v13_v6 }
 0x119   :  { %v104_v28 = vsel %vm24_vm1, %v100_v27, 0.0  ;;  %v108_v29 = vmul.f32 %v100_v27, %v100_v27 }
 0x11a   :  { %105 = vadd.xlane.f32.xlu0 %v104_v28 }
 0x11b   :  { %v112_v30 = vsel %vm24_vm1, %v108_v29, 0.0 }
 0x11c   :  { %113 = vadd.xlane.f32.xlu1 %v112_v30 }
 0x181   :  { %v103_v31 = vpop.xlane.xlu0 %102 }
 0x182   :  { %v115_v32 = vmul.f32 0.03125, %v103_v31 }
 0x183   :  { %v111_v33 = vpop.xlane.xlu1 %110 }
 0x184   :  { %v119_v34 = vmul.f32 %v115_v32, %v115_v32  ;;  %v117_v35 = vmul.f32 0.03125, %v111_v33  ;;  %v123_v52 = vsub.f32 %v99_v21, %v115_v32 }
 0x186   :  { %v121_v36 = vsub.f32 %v117_v35, %v119_v34 }
 0x188   :  { %v125_v37 = vadd.f32 1e-05, %v121_v36 }
 0x18a   :  { %194 = vrsqrt.f32 %v125_v37  ;;  %vm133_vm3 = vweird.f32 %v125_v37 }
 0x18d   :  { %v106_v38 = vpop.xlane.xlu0 %105 }
 0x18e   :  { %v116_v39 = vmul.f32 0.03125, %v106_v38 }
 0x18f   :  { %v114_v40 = vpop.xlane.xlu1 %113 }
 0x190   :  { %v195_v41 = vpop.eup %194  ;;  %v120_v42 = vmul.f32 %v116_v39, %v116_v39  ;;  %v118_v43 = vmul.f32 0.03125, %v114_v40  ;;  %v124_v0 = vsub.f32 %v100_v27, %v116_v39 }
 0x191   :  { %v128_v44 = vmul.f32 %v195_v41, %v125_v37  ;;  %vm134_vm2 = vweird.f32 %v195_v41 }
 0x192   :  { %v122_v45 = vsub.f32 %v118_v43, %v120_v42  ;;  %vm135_vm4 = vmor %vm133_vm3, %vm134_vm2 }
 0x193   :  { %v129_v46 = vmul.f32 %v195_v41, %v128_v44 }
 0x194   :  { %v126_v47 = vadd.f32 1e-05, %v122_v45 }
 0x195   :  { %v130_v48 = vmul.f32 0.5, %v129_v46 }
 0x196   :  { %196 = vrsqrt.f32 %v126_v47  ;;  %vm143_vm6 = vweird.f32 %v126_v47 }
 0x197   :  { %v131_v49 = vsub.f32 1.5, %v130_v48 }
 0x199   :  { %v132_v50 = vmul.f32 %v195_v41, %v131_v49 }
 0x19b   :  { %v136_v53 = vsel %vm135_vm4, %v195_v41, %v132_v50 }
 0x19c   :  { %v197_v54 = vpop.eup %196  ;;  %v147_v56 = vmul.f32 %v136_v53, %v123_v52 }
 0x19d   :  { %v138_v57 = vmul.f32 %v197_v54, %v126_v47  ;;  %vm144_vm5 = vweird.f32 %v197_v54 }
 0x19e   :  { %v150_v58 = vmul.f32 %v149_v51, %v147_v56  ;;  %vm145_vm7 = vmor %vm143_vm6, %vm144_vm5 }
 0x19f   :  { %v139_v59 = vmul.f32 %v197_v54, %v138_v57 }
 0x1a0   :  { %v153_v60 = vadd.f32 %v152_v55, %v150_v58 }
 0x1a1   :  { %v140_v61 = vmul.f32 0.5, %v139_v59 }
 0x1a2   :  { %155 = vst.msk [vmem:[#allocation2] sm:$0xff] %vm24_vm1, %v153_v60 }
 0x1a3   :  { %v141_v62 = vsub.f32 1.5, %v140_v61 }
 0x1a5   :  { %v142_v63 = vmul.f32 %v197_v54, %v141_v62 }
 0x1a7   :  { %v146_v1 = vsel %vm145_vm7, %v197_v54, %v142_v63 }
 0x1a8   :  { %v148_v2 = vmul.f32 %v146_v1, %v124_v0 }
 0x1aa   :  { %v151_v3 = vmul.f32 %v149_v51, %v148_v2 }
 0x1ac   :  { %v154_v4 = vadd.f32 %v152_v55, %v151_v3 }
 0x1ae   :  { %156 = vst.msk [vmem:[#allocation2 + $0x8] sm:$0xff] %vm24_vm1, %v154_v4 }
 0x1af   :  { %169 = dma.vmem_to_hbm [thread:$0]  %s162_s30, 256, %s164_s5, [#allocation3], %s225_s6, %s225_s6, %s226_s7  }
 0x1b0   :  { %222 = dma.done.wait [#allocation3], 256  }
 0x1b1   :  { %223 = vsyncadd [#allocation3], 4294967040 }
 0x1b2   :  { %174 = vsyncpa [#allocation3], 1 }

</bundles_post_ra>
